<compile_context>
chip_gen: v7x
topology: tpu7x:2x2x1
jax: 0.10.0
libtpu: 0.0.40
codegen_flags: <defaults>
</compile_context>

<pallas_src>
import functools

import numpy as np
import jax
import jax.numpy as jnp
from jax import lax
from jax.experimental import pallas as pl
from jax.experimental.pallas import tpu as pltpu


def gaussian_1d_np(window_size: int, sigma: float) -> np.ndarray:
    """1D Gaussian taps, identical math to the PyTorch helper (f32)."""
    coords = np.arange(window_size, dtype=np.float32) - window_size // 2
    g = np.exp(-(coords ** 2) / np.float32(2.0 * sigma * sigma)).astype(np.float32)
    return (g / g.sum(dtype=np.float32)).astype(np.float32)


def conv_matrix_np(n: int, g: np.ndarray) -> np.ndarray:
    """Banded Toeplitz T so that (x @ T) is a 1D 'same' conv with zero pad.

    out[j] = sum_k g[k] * x[j + k - pad]  =>  T[m, j] = g[m - j + pad].
    Taps falling outside [0, n) are simply absent (== zero padding).
    g is symmetric, so T is symmetric and also serves as the H-pass matrix.
    """
    k = len(g)
    pad = k // 2
    m = np.arange(n)[:, None]
    j = np.arange(n)[None, :]
    d = m - j + pad
    valid = (d >= 0) & (d < k)
    return np.where(valid, g[np.clip(d, 0, k - 1)], np.float32(0.0)).astype(np.float32)


def _pick_pack(bc: int, w: int, lane_target: int = 128) -> int:
    """Largest divisor G of bc with G * w <= lane_target (>= 1)."""
    g_max = max(1, lane_target // max(w, 1))
    best = 1
    for cand in range(1, min(bc, g_max) + 1):
        if bc % cand == 0:
            best = cand
    return best


def _ssim_slab_kernel(x_ref, y_ref, th_ref, tw_ref, out_ref, *, c1, c2):
    """One (H, G*W) slab (G packed (b, c) slices) per grid step.

    x_ref / y_ref : (1, H, G*W) input blocks in VMEM.
    th_ref        : (H, H)   banded Gaussian matrix (H pass), resident.
    tw_ref        : (GW, GW) block-diagonal banded matrix (W pass), resident.
    out_ref       : (1, 1)   partial SSIM sum for this slab, in SMEM.
    """
    x = x_ref[0].astype(jnp.float32)   # (H, GW)
    y = y_ref[0].astype(jnp.float32)   # (H, GW)
    th = th_ref[...]                   # (H, H)
    tw = tw_ref[...]                   # (GW, GW)

    def sep_conv(field):
        # W pass on the MXU: lane-axis contraction against the banded matrix.
        t = jnp.dot(field, tw, preferred_element_type=jnp.float32)
        # H pass on the MXU.
        return jnp.dot(th, t, preferred_element_type=jnp.float32)

    # Five depthwise-Gaussian-filtered fields; products formed once in f32.
    mu1 = sep_conv(x)
    mu2 = sep_conv(y)
    e11 = sep_conv(x * x)
    e22 = sep_conv(y * y)
    e12 = sep_conv(x * y)

    mu1_sq = mu1 * mu1
    mu2_sq = mu2 * mu2
    mu1_mu2 = mu1 * mu2
    sigma1_sq = e11 - mu1_sq
    sigma2_sq = e22 - mu2_sq
    sigma12 = e12 - mu1_mu2

    num = (2.0 * mu1_mu2 + c1) * (2.0 * sigma12 + c2)
    den = (mu1_sq + mu2_sq + c1) * (sigma1_sq + sigma2_sq + c2)
    ssim_map = num / den

    # Partial sum for this slab; final mean + (1 - .) done in the wrapper.
    out_ref[0, 0] = jnp.sum(ssim_map)


def ssim_loss(img1, img2, window_size: int = 11, sigma: float = 1.5):
    """Pallas implementation of SSIMLoss.forward (size_average=True)."""
    assert img1.shape == img2.shape
    b, c, h, w = img1.shape
    bc = b * c

    g = gaussian_1d_np(window_size, sigma)

    # --- lane packing: G slices side by side along the lane axis -----------
    gpack = _pick_pack(bc, w)
    gw = gpack * w
    steps = bc // gpack

    x = img1.reshape(steps, gpack, h, w)
    y = img2.reshape(steps, gpack, h, w)
    x = jnp.transpose(x, (0, 2, 1, 3)).reshape(steps, h, gw)
    y = jnp.transpose(y, (0, 2, 1, 3)).reshape(steps, h, gw)

    # --- banded (Toeplitz) Gaussian matrices --------------------------------
    th = jnp.asarray(conv_matrix_np(h, g))                             # (H, H)
    tw_band = conv_matrix_np(w, g)                                     # (W, W)
    tw = jnp.asarray(np.kron(np.eye(gpack, dtype=np.float32), tw_band))  # (GW, GW)

    kernel = functools.partial(_ssim_slab_kernel, c1=0.01 ** 2, c2=0.03 ** 2)

    # --- VMEM budget ---------------------------------------------------------
    itemsize = img1.dtype.itemsize
    in_bytes = 2 * 2 * h * gw * itemsize          # x, y double-buffered
    mat_bytes = 2 * (h * h + gw * gw) * 4         # Th, Tw (double-buffered)
    tmp_bytes = 14 * h * gw * 4                   # f32 temporaries
    vmem_need = in_bytes + mat_bytes + tmp_bytes
    try:
        vmem_cap = int(pltpu.get_tpu_info().vmem_capacity_bytes)
    except Exception:
        vmem_cap = 64 * 2 ** 20                   # conservative (v7x per-TC)
    vmem_limit = int(min(int(0.75 * vmem_cap),
                         max(16 * 2 ** 20, 2 * vmem_need)))

    # --- advisory cost estimate ---------------------------------------------
    flops = int(steps) * (5 * 2 * h * gw * (gw + h) + 30 * h * gw)
    bytes_accessed = int(2 * bc * h * w * itemsize + (h * h + gw * gw) * 4
                         + steps * 4)

    partial = pl.pallas_call(
        kernel,
        out_shape=jax.ShapeDtypeStruct((steps, 1), jnp.float32),
        grid_spec=pltpu.PrefetchScalarGridSpec(
            num_scalar_prefetch=0,
            grid=(steps,),
            in_specs=[
                pl.BlockSpec((1, h, gw), lambda i: (i, 0, 0)),
                pl.BlockSpec((1, h, gw), lambda i: (i, 0, 0)),
                pl.BlockSpec((h, h), lambda i: (0, 0)),      # resident in VMEM
                pl.BlockSpec((gw, gw), lambda i: (0, 0)),    # resident in VMEM
            ],
            out_specs=pl.BlockSpec((1, 1), lambda i: (i, 0),
                                   memory_space=pltpu.MemorySpace.SMEM),
        ),
        compiler_params=pltpu.CompilerParams(
            dimension_semantics=("parallel",),
            vmem_limit_bytes=vmem_limit,
        ),
        cost_estimate=pl.CostEstimate(
            flops=flops, transcendentals=0, bytes_accessed=bytes_accessed),
    )(x, y, th, tw)

    return 1.0 - jnp.sum(partial) / float(bc * h * w)


def ssim_loss_ref(img1, img2, window_size: int = 11, sigma: float = 1.5):
    """Pure-JAX reference (mirrors F.conv2d with groups=C)."""
    c = img1.shape[1]
    pad = window_size // 2
    g = jnp.asarray(gaussian_1d_np(window_size, sigma))
    win = g[:, None] * g[None, :]
    kern = jnp.broadcast_to(win, (c, 1, window_size, window_size))

    def dwconv(x):
        return lax.conv_general_dilated(
            x, kern, window_strides=(1, 1),
            padding=[(pad, pad), (pad, pad)],
            dimension_numbers=("NCHW", "OIHW", "NCHW"),
            feature_group_count=c,
            precision=lax.Precision.HIGHEST)

    mu1 = dwconv(img1)
    mu2 = dwconv(img2)
    mu1_sq, mu2_sq, mu1_mu2 = mu1 * mu1, mu2 * mu2, mu1 * mu2
    sigma1_sq = dwconv(img1 * img1) - mu1_sq
    sigma2_sq = dwconv(img2 * img2) - mu2_sq
    sigma12 = dwconv(img1 * img2) - mu1_mu2
    c1, c2 = 0.01 ** 2, 0.03 ** 2
    ssim_map = ((2 * mu1_mu2 + c1) * (2 * sigma12 + c2) /
                ((mu1_sq + mu2_sq + c1) * (sigma1_sq + sigma2_sq + c2)))
    return 1.0 - jnp.mean(ssim_map)


if __name__ == "__main__":
    key = jax.random.PRNGKey(0)
    k1, k2 = jax.random.split(key)
    B, C, H, W = 2, 4, 16, 16
    img1 = jax.random.uniform(k1, (B, C, H, W), dtype=jnp.float32)
    img2 = jax.random.uniform(k2, (B, C, H, W), dtype=jnp.float32)

    loss = jax.block_until_ready(jax.jit(ssim_loss)(img1, img2))
    ref = jax.block_until_ready(ssim_loss_ref(img1, img2))

    assert jnp.isfinite(loss), "non-finite loss"
    assert abs(float(loss) - float(ref)) < 3e-3, (float(loss), float(ref))
    print("KERNEL_OK")
</pallas_src>

<mosaic_0001>
module attributes {stable_mosaic.version = 11 : i64} {
  func.func @_ssim_slab_kernel(%arg0: i32, %arg1: memref<1x16x128xf32, #tpu.memory_space<vmem>>, %arg2: memref<1x16x128xf32, #tpu.memory_space<vmem>>, %arg3: memref<16x16xf32, #tpu.memory_space<vmem>>, %arg4: memref<128x128xf32, #tpu.memory_space<vmem>>, %arg5: memref<1x1xf32, #tpu.memory_space<smem>>) attributes {dimension_semantics = [#tpu.dimension_semantics<parallel>], iteration_bounds = array<i64: 1>, scalar_prefetch = 0 : i64, scratch_operands = 0 : i64, tpu.core_type = #tpu.core_type<tc>, window_params = [{transform_indices = @transform_0, window_bounds = array<i64: 1, 16, 128>}, {transform_indices = @transform_1, window_bounds = array<i64: 1, 16, 128>}, {pipeline_mode = #tpu.pipeline_mode<synchronous>, transform_indices = @transform_2, window_bounds = array<i64: 16, 16>}, {pipeline_mode = #tpu.pipeline_mode<synchronous>, transform_indices = @transform_3, window_bounds = array<i64: 128, 128>}, {transform_indices = @transform_4, window_bounds = array<i64: 1, 1>}]} {
    %c0 = arith.constant 0 : index
    %c0_0 = arith.constant 0 : index
    %c0_1 = arith.constant 0 : index
    %0 = vector.load %arg1[%c0, %c0_0, %c0_1] : memref<1x16x128xf32, #tpu.memory_space<vmem>>, vector<1x16x128xf32>
    %1 = vector.shape_cast %0 : vector<1x16x128xf32> to vector<16x128xf32>
    %c0_2 = arith.constant 0 : index
    %c0_3 = arith.constant 0 : index
    %c0_4 = arith.constant 0 : index
    %2 = vector.load %arg2[%c0_2, %c0_3, %c0_4] : memref<1x16x128xf32, #tpu.memory_space<vmem>>, vector<1x16x128xf32>
    %3 = vector.shape_cast %2 : vector<1x16x128xf32> to vector<16x128xf32>
    %c0_5 = arith.constant 0 : index
    %c0_6 = arith.constant 0 : index
    %4 = vector.load %arg3[%c0_5, %c0_6] : memref<16x16xf32, #tpu.memory_space<vmem>>, vector<16x16xf32>
    %c0_7 = arith.constant 0 : index
    %c0_8 = arith.constant 0 : index
    %5 = vector.load %arg4[%c0_7, %c0_8] : memref<128x128xf32, #tpu.memory_space<vmem>>, vector<128x128xf32>
    %cst = arith.constant dense<0.000000e+00> : vector<16x128xf32>
    %6 = tpu.matmul %1, %5, %cst {dimension_numbers = #tpu.dot_dimension_numbers<[1], [0], [0], [1], [0, 0, 1, 1], [], []>} : vector<16x128xf32>, vector<128x128xf32>, vector<16x128xf32> -> vector<16x128xf32>
    %cst_9 = arith.constant dense<0.000000e+00> : vector<16x128xf32>
    %7 = tpu.matmul %4, %6, %cst_9 {dimension_numbers = #tpu.dot_dimension_numbers<[1], [0], [0], [1], [0, 0, 1, 1], [], []>} : vector<16x16xf32>, vector<16x128xf32>, vector<16x128xf32> -> vector<16x128xf32>
    %cst_10 = arith.constant dense<0.000000e+00> : vector<16x128xf32>
    %8 = tpu.matmul %3, %5, %cst_10 {dimension_numbers = #tpu.dot_dimension_numbers<[1], [0], [0], [1], [0, 0, 1, 1], [], []>} : vector<16x128xf32>, vector<128x128xf32>, vector<16x128xf32> -> vector<16x128xf32>
    %cst_11 = arith.constant dense<0.000000e+00> : vector<16x128xf32>
    %9 = tpu.matmul %4, %8, %cst_11 {dimension_numbers = #tpu.dot_dimension_numbers<[1], [0], [0], [1], [0, 0, 1, 1], [], []>} : vector<16x16xf32>, vector<16x128xf32>, vector<16x128xf32> -> vector<16x128xf32>
    %10 = arith.mulf %1, %1 : vector<16x128xf32>
    %cst_12 = arith.constant dense<0.000000e+00> : vector<16x128xf32>
    %11 = tpu.matmul %10, %5, %cst_12 {dimension_numbers = #tpu.dot_dimension_numbers<[1], [0], [0], [1], [0, 0, 1, 1], [], []>} : vector<16x128xf32>, vector<128x128xf32>, vector<16x128xf32> -> vector<16x128xf32>
    %cst_13 = arith.constant dense<0.000000e+00> : vector<16x128xf32>
    %12 = tpu.matmul %4, %11, %cst_13 {dimension_numbers = #tpu.dot_dimension_numbers<[1], [0], [0], [1], [0, 0, 1, 1], [], []>} : vector<16x16xf32>, vector<16x128xf32>, vector<16x128xf32> -> vector<16x128xf32>
    %13 = arith.mulf %3, %3 : vector<16x128xf32>
    %cst_14 = arith.constant dense<0.000000e+00> : vector<16x128xf32>
    %14 = tpu.matmul %13, %5, %cst_14 {dimension_numbers = #tpu.dot_dimension_numbers<[1], [0], [0], [1], [0, 0, 1, 1], [], []>} : vector<16x128xf32>, vector<128x128xf32>, vector<16x128xf32> -> vector<16x128xf32>
    %cst_15 = arith.constant dense<0.000000e+00> : vector<16x128xf32>
    %15 = tpu.matmul %4, %14, %cst_15 {dimension_numbers = #tpu.dot_dimension_numbers<[1], [0], [0], [1], [0, 0, 1, 1], [], []>} : vector<16x16xf32>, vector<16x128xf32>, vector<16x128xf32> -> vector<16x128xf32>
    %16 = arith.mulf %1, %3 : vector<16x128xf32>
    %cst_16 = arith.constant dense<0.000000e+00> : vector<16x128xf32>
    %17 = tpu.matmul %16, %5, %cst_16 {dimension_numbers = #tpu.dot_dimension_numbers<[1], [0], [0], [1], [0, 0, 1, 1], [], []>} : vector<16x128xf32>, vector<128x128xf32>, vector<16x128xf32> -> vector<16x128xf32>
    %cst_17 = arith.constant dense<0.000000e+00> : vector<16x128xf32>
    %18 = tpu.matmul %4, %17, %cst_17 {dimension_numbers = #tpu.dot_dimension_numbers<[1], [0], [0], [1], [0, 0, 1, 1], [], []>} : vector<16x16xf32>, vector<16x128xf32>, vector<16x128xf32> -> vector<16x128xf32>
    %19 = arith.mulf %7, %7 : vector<16x128xf32>
    %20 = arith.mulf %9, %9 : vector<16x128xf32>
    %21 = arith.mulf %7, %9 : vector<16x128xf32>
    %22 = arith.subf %12, %19 : vector<16x128xf32>
    %23 = arith.subf %15, %20 : vector<16x128xf32>
    %24 = arith.subf %18, %21 : vector<16x128xf32>
    %cst_18 = arith.constant 2.000000e+00 : f32
    %25 = vector.broadcast %cst_18 : f32 to vector<16x128xf32>
    %26 = arith.mulf %25, %21 : vector<16x128xf32>
    %cst_19 = arith.constant 9.99999974E-5 : f32
    %27 = vector.broadcast %cst_19 : f32 to vector<16x128xf32>
    %28 = arith.addf %26, %27 : vector<16x128xf32>
    %cst_20 = arith.constant 2.000000e+00 : f32
    %29 = vector.broadcast %cst_20 : f32 to vector<16x128xf32>
    %30 = arith.mulf %29, %24 : vector<16x128xf32>
    %cst_21 = arith.constant 8.99999984E-4 : f32
    %31 = vector.broadcast %cst_21 : f32 to vector<16x128xf32>
    %32 = arith.addf %30, %31 : vector<16x128xf32>
    %33 = arith.mulf %28, %32 : vector<16x128xf32>
    %34 = arith.addf %19, %20 : vector<16x128xf32>
    %cst_22 = arith.constant 9.99999974E-5 : f32
    %35 = vector.broadcast %cst_22 : f32 to vector<16x128xf32>
    %36 = arith.addf %34, %35 : vector<16x128xf32>
    %37 = arith.addf %22, %23 : vector<16x128xf32>
    %cst_23 = arith.constant 8.99999984E-4 : f32
    %38 = vector.broadcast %cst_23 : f32 to vector<16x128xf32>
    %39 = arith.addf %37, %38 : vector<16x128xf32>
    %40 = arith.mulf %36, %39 : vector<16x128xf32>
    %41 = arith.divf %33, %40 : vector<16x128xf32>
    %42 = vector.shape_cast %41 : vector<16x128xf32> to vector<1x16x128xf32>
    %cst_24 = arith.constant dense<0.000000e+00> : vector<1xf32>
    %43 = vector.multi_reduction <add>, %42, %cst_24 [1, 2] : vector<1x16x128xf32> to vector<1xf32>
    %44 = vector.shape_cast %43 : vector<1xf32> to vector<1x1x1xf32>
    %45 = vector.extract %44[0, 0, 0] : f32 from vector<1x1x1xf32>
    %c0_25 = arith.constant 0 : index
    %c0_26 = arith.constant 0 : index
    %46 = memref.load %arg5[%c0_25, %c0_26] : memref<1x1xf32, #tpu.memory_space<smem>>
    memref.store %45, %arg5[%c0_25, %c0_26] : memref<1x1xf32, #tpu.memory_space<smem>>
    return
  }
  func.func @transform_0(%arg0: i32) -> (i32, i32, i32) {
    %c0_i32 = arith.constant 0 : i32
    %c0_i32_0 = arith.constant 0 : i32
    %c0_i32_1 = arith.constant 0 : i32
    return %arg0, %c0_i32, %c0_i32_0 : i32, i32, i32
  }
  func.func @transform_1(%arg0: i32) -> (i32, i32, i32) {
    %c0_i32 = arith.constant 0 : i32
    %c0_i32_0 = arith.constant 0 : i32
    %c0_i32_1 = arith.constant 0 : i32
    return %arg0, %c0_i32, %c0_i32_0 : i32, i32, i32
  }
  func.func @transform_2(%arg0: i32) -> (i32, i32) {
    %c0_i32 = arith.constant 0 : i32
    %c0_i32_0 = arith.constant 0 : i32
    %c0_i32_1 = arith.constant 0 : i32
    return %c0_i32, %c0_i32_0 : i32, i32
  }
  func.func @transform_3(%arg0: i32) -> (i32, i32) {
    %c0_i32 = arith.constant 0 : i32
    %c0_i32_0 = arith.constant 0 : i32
    %c0_i32_1 = arith.constant 0 : i32
    return %c0_i32, %c0_i32_0 : i32, i32
  }
  func.func @transform_4(%arg0: i32) -> (i32, i32) {
    %c0_i32 = arith.constant 0 : i32
    %c0_i32_0 = arith.constant 0 : i32
    return %arg0, %c0_i32 : i32, i32
  }
}

</mosaic_0001>

<bundles_post_ra>
// kernel: ssim_loss.1
= control target key start
LH: loop header
LB: loop body
LE: loop exit
PB: predicated region body
PF: predicated region fallthrough
CT: control target
= control target key end

     0   :  { %s1629_s0 = inlined_call_operand.vmem [shape: f32[1,16,128], index: 0, kind: input, shape index: {}]   ;;  %s1630_s1 = inlined_call_operand.vmem [shape: f32[1,16,128], index: 1, kind: input, shape index: {}]   ;;  %s1631_s2 = inlined_call_operand.vmem [shape: f32[16,16], index: 2, kind: input, shape index: {}]   ;;  %s1632_s3 = inlined_call_operand.vmem [shape: f32[128,128], index: 3, kind: input, shape index: {}]   ;;  %s1633_s4 = inlined_call_operand.hbm [shape: f32[1,1], index: 4, kind: output, shape index: {}]  }
   0x1   :  { %v24_v0 = vld [vmem:[%s1632_s3] sm:$0xff]  ;;  %v25_v1 = vld [vmem:[%s1632_s3 + $0x8] sm:$0xff]  ;;  %v26_v2 = vld [vmem:[%s1632_s3 + $0x10] sm:$0xff] }
   0x2   :  { %v1428_v3 = vpack.c.bf16 %v25_v1, %v24_v0  ;;  %v27_v4 = vld [vmem:[%s1632_s3 + $0x18] sm:$0xff]  ;;  %v28_v6 = vld [vmem:[%s1632_s3 + $0x20] sm:$0xff]  ;;  %v29_v7 = vld [vmem:[%s1632_s3 + $0x28] sm:$0xff] }
   0x3   :  { %v1433_v5 = vpack.c.bf16 %v27_v4, %v26_v2  ;;  %v1444_v8 = vpack.c.bf16 %v29_v7, %v28_v6  ;;  %v1449_v9 = vld [vmem:[%s1629_s0] sm:$0xff]  ;;  %v30_v10 = vld [vmem:[%s1632_s3 + $0x30] sm:$0xff]  ;;  %v31_v11 = vld [vmem:[%s1632_s3 + $0x38] sm:$0xff] }
   0x4   :  { %1195 = vmatprep.subr.bf16.mxu0 %v1428_v3  ;;  %1016 = vmatprep.mubr.f32.mxu0 %v1449_v9 }
   0x5   :  { %1197 = vmatpush3.bf16.msra.mxu0 %v1428_v3 }
   0x6   :  { %1199 = vmatprep.subr.bf16.mxu0 %v1433_v5 }
   0x7   :  { %9 = vsyncpa [#allocation3], 0  ;;  %v1460_v12 = vpack.c.bf16 %v31_v11, %v30_v10  ;;  %v32_v13 = vld [vmem:[%s1632_s3 + $0x40] sm:$0xff]  ;;  %v33_v14 = vld [vmem:[%s1632_s3 + $0x48] sm:$0xff]  ;;  %vm115_vm0 = vcmask 130048   ;;  %v347_v28 = vmul.f32 %v1449_v9, %v1449_v9  ;;  %s1381_s6 = scalar_lea.hbm %s1633_s4, 16 }
   0x8   :  { %v1470_v15 = vpack.c.bf16 %v33_v14, %v32_v13  ;;  %v34_v16 = vld [vmem:[%s1632_s3 + $0x50] sm:$0xff]  ;;  %v35_v17 = vld [vmem:[%s1632_s3 + $0x58] sm:$0xff]  ;;  %v36_v19 = vld [vmem:[%s1632_s3 + $0x60] sm:$0xff]  ;;  %p1382_p0 = scmp.ne.s32.totalorder %s1633_s4, %s1381_s6  ;;  %p1385_p1 = scmp.lt.u32.totalorder %s1381_s6, %s1633_s4 }
   0x9   :  { %1201 = vmatpush3.bf16.msra.mxu0 %v1433_v5  ;;  %v1480_v18 = vpack.c.bf16 %v35_v17, %v34_v16  ;;  %v37_v20 = vld [vmem:[%s1632_s3 + $0x68] sm:$0xff]  ;;  %v38_v22 = vld [vmem:[%s1632_s3 + $0x70] sm:$0xff]  ;;  %v39_v23 = vld [vmem:[%s1632_s3 + $0x78] sm:$0xff] }
   0xa   :  { %1203 = vmatprep.subr.bf16.mxu0 %v1444_v8  ;;  %v1490_v21 = vpack.c.bf16 %v37_v20, %v36_v19  ;;  %v1500_v24 = vpack.c.bf16 %v39_v23, %v38_v22  ;;  %v1508_v25 = vld [vmem:[%s1629_s0 + $0x8] sm:$0xff]  ;;  %v1531_v26 = vld [vmem:[%s1631_s2] sm:$0xff]  ;;  %p1387_p2 = pnand %p1385_p1, %p1382_p0 }
   0xb   :  { %1023 = vmatprep.mubr.msk.f32.mxu1 %vm115_vm0, %v1531_v26  ;;  %v348_v27 = vmul.f32 %v1508_v25, %v1508_v25  ;;  %v1557_v32 = vld [vmem:[%s1631_s2 + $0x8] sm:$0xff]  ;;  %v20_v33 = vld [vmem:[%s1630_s1] sm:$0xff] }
   0xc   :  { %v21_v34 = vld [vmem:[%s1630_s1 + $0x8] sm:$0xff]  ;;  %v651_v39 = vmul.f32 %v20_v33, %v1449_v9  ;;  %v499_v45 = vmul.f32 %v20_v33, %v20_v33 }
   0xd   :  { %1205 = vmatpush3.bf16.msra.mxu0 %v1444_v8  ;;  %v652_v38 = vmul.f32 %v21_v34, %v1508_v25  ;;  %v500_v46 = vmul.f32 %v21_v34, %v21_v34 }
   0xe   :  { %1207 = vmatprep.subr.bf16.mxu0 %v1460_v12 }
  0x11   :  { %1209 = vmatpush3.bf16.msra.mxu0 %v1460_v12 }
  0x12   :  { %1211 = vmatprep.subr.bf16.mxu0 %v1470_v15 }
  0x15   :  { %1213 = vmatpush3.bf16.msra.mxu0 %v1470_v15 }
  0x16   :  { %1215 = vmatprep.subr.bf16.mxu0 %v1480_v18 }
  0x19   :  { %1217 = vmatpush3.bf16.msra.mxu0 %v1480_v18 }
  0x1a   :  { %1219 = vmatprep.subr.bf16.mxu0 %v1490_v21 }
  0x1d   :  { %1221 = vmatpush3.bf16.msra.mxu0 %v1490_v21 }
  0x1e   :  { %1223 = vmatprep.subr.bf16.mxu0 %v1500_v24 }
  0x21   :  { %1225 = vmatpush3.bf16.msra.mxu0 %v1500_v24 }
  0x22   :  { %1267 = vmatprep.subr.bf16.mxu0 %v1428_v3 }
  0x24   :  { %1017 = vmatmul.mubr.f32.vlgmr.msra.gmra.mrb[0].mxu0 %v1508_v25 }
  0x25   :  { %1269 = vmatpush3.bf16.msra.mxu0 %v1428_v3  ;;  %1100 = vmatprep.mubr.f32.mxu0 %v347_v28 }
  0x26   :  { %1271 = vmatprep.subr.bf16.mxu0 %v1433_v5 }
  0x29   :  { %1273 = vmatpush3.bf16.msra.mxu0 %v1433_v5 }
  0x2a   :  { %1275 = vmatprep.subr.bf16.mxu0 %v1444_v8 }
  0x2d   :  { %1277 = vmatpush3.bf16.msra.mxu0 %v1444_v8 }
  0x2e   :  { %1279 = vmatprep.subr.bf16.mxu0 %v1460_v12 }
  0x31   :  { %1281 = vmatpush3.bf16.msra.mxu0 %v1460_v12 }
  0x32   :  { %1283 = vmatprep.subr.bf16.mxu0 %v1470_v15 }
  0x35   :  { %1285 = vmatpush3.bf16.msra.mxu0 %v1470_v15 }
  0x36   :  { %1287 = vmatprep.subr.bf16.mxu0 %v1480_v18 }
  0x39   :  { %1289 = vmatpush3.bf16.msra.mxu0 %v1480_v18 }
  0x3a   :  { %1291 = vmatprep.subr.bf16.mxu0 %v1490_v21 }
  0x3d   :  { %1293 = vmatpush3.bf16.msra.mxu0 %v1490_v21 }
  0x3e   :  { %1295 = vmatprep.subr.bf16.mxu0 %v1500_v24 }
  0x41   :  { %1297 = vmatpush3.bf16.msra.mxu0 %v1500_v24 }
  0x42   :  { %1339 = vmatprep.subr.bf16.mxu0 %v1428_v3 }
  0x44   :  { %1101 = vmatmul.mubr.f32.vlgmr.msra.gmra.mrb[2].mxu0 %v348_v27 }
  0x45   :  { %1341 = vmatpush3.bf16.msra.mxu0 %v1428_v3  ;;  %1184 = vmatprep.mubr.f32.mxu0 %v651_v39 }
  0x46   :  { %1343 = vmatprep.subr.bf16.mxu0 %v1433_v5 }
  0x49   :  { %1345 = vmatpush3.bf16.msra.mxu0 %v1433_v5 }
  0x4a   :  { %1347 = vmatprep.subr.bf16.mxu0 %v1444_v8 }
  0x4d   :  { %1349 = vmatpush3.bf16.msra.mxu0 %v1444_v8 }
  0x4e   :  { %1351 = vmatprep.subr.bf16.mxu0 %v1460_v12 }
  0x51   :  { %1353 = vmatpush3.bf16.msra.mxu0 %v1460_v12 }
  0x52   :  { %1355 = vmatprep.subr.bf16.mxu0 %v1470_v15 }
  0x55   :  { %1357 = vmatpush3.bf16.msra.mxu0 %v1470_v15 }
  0x56   :  { %1359 = vmatprep.subr.bf16.mxu0 %v1480_v18 }
  0x59   :  { %1361 = vmatpush3.bf16.msra.mxu0 %v1480_v18 }
  0x5a   :  { %1363 = vmatprep.subr.bf16.mxu0 %v1490_v21 }
  0x5d   :  { %1365 = vmatpush3.bf16.msra.mxu0 %v1490_v21 }
  0x5e   :  { %1367 = vmatprep.subr.bf16.mxu0 %v1500_v24 }
  0x61   :  { %1369 = vmatpush3.bf16.msra.mxu0 %v1500_v24 }
  0x64   :  { %1185 = vmatmul.mubr.f32.vlgmr.msra.gmra.mrb[4].mxu0 %v652_v38 }
  0xf7   :  { %v1018_v29 = vpop.f32.mrb[0].mxu0 }
  0xf8   :  { %v106_v30 = vpop.f32.mrb[1].mxu0 }
  0xf9   :  { %v1226_v31 = vpack.c.bf16 %v1018_v29, %v106_v30 }
  0xfb   :  { %1227 = vmatprep.subr.bf16.mxu1 %v1226_v31 }
  0xfc   :  { %1229 = vmatpush3.bf16.msra.mxu1 %v1226_v31 }
  0xfd   :  { %1231 = vmatprep.subr.bf16.mxu1 %v1428_v3 }
  0xff   :  { %1024 = vmatmul.mubr.msk.f32.vlgmr.msra.gmra.mrb[0].mxu1 %vm115_vm0, %v1557_v32 }
 0x100   :  { %1233 = vmatpush3.bf16.msra.mxu1 %v1428_v3  ;;  %1058 = vmatprep.mubr.f32.mxu1 %v20_v33 }
 0x101   :  { %1235 = vmatprep.subr.bf16.mxu1 %v1433_v5 }
 0x104   :  { %1237 = vmatpush3.bf16.msra.mxu1 %v1433_v5 }
 0x105   :  { %1239 = vmatprep.subr.bf16.mxu1 %v1444_v8 }
 0x108   :  { %1241 = vmatpush3.bf16.msra.mxu1 %v1444_v8 }
 0x109   :  { %1243 = vmatprep.subr.bf16.mxu1 %v1460_v12 }
 0x10c   :  { %1245 = vmatpush3.bf16.msra.mxu1 %v1460_v12 }
 0x10d   :  { %1247 = vmatprep.subr.bf16.mxu1 %v1470_v15 }
 0x110   :  { %1249 = vmatpush3.bf16.msra.mxu1 %v1470_v15 }
 0x111   :  { %1251 = vmatprep.subr.bf16.mxu1 %v1480_v18 }
 0x114   :  { %1253 = vmatpush3.bf16.msra.mxu1 %v1480_v18 }
 0x115   :  { %1255 = vmatprep.subr.bf16.mxu1 %v1490_v21 }
 0x117   :  { %v1102_v35 = vpop.f32.mrb[2].mxu0 }
 0x118   :  { %1257 = vmatpush3.bf16.msra.mxu1 %v1490_v21  ;;  %v415_v36 = vpop.f32.mrb[3].mxu0 }
 0x119   :  { %1259 = vmatprep.subr.bf16.mxu1 %v1500_v24  ;;  %v1298_v37 = vpack.c.bf16 %v1102_v35, %v415_v36 }
 0x11c   :  { %1261 = vmatpush3.bf16.msra.mxu1 %v1500_v24 }
 0x11f   :  { %1059 = vmatmul.mubr.f32.vlgmr.msra.gmra.mrb[2].mxu1 %v21_v34 }
 0x120   :  { %1065 = vmatprep.mubr.msk.f32.mxu1 %vm115_vm0, %v1531_v26 }
 0x137   :  { %v1186_v47 = vpop.f32.mrb[4].mxu0 }
 0x138   :  { %v719_v48 = vpop.f32.mrb[5].mxu0 }
 0x139   :  { %v1370_v49 = vpack.c.bf16 %v1186_v47, %v719_v48 }
 0x1d2   :  { %v1025_v40 = vpop.f32.mrb[0].mxu1 }
 0x1d3   :  { %v188_v41 = vpop.f32.mrb[1].mxu1  ;;  %v804_v51 = vmul.f32 %v1025_v40, %v1025_v40 }
 0x1d4   :  { %v803_v55 = vmul.f32 %v188_v41, %v188_v41 }
 0x1f2   :  { %v1060_v42 = vpop.f32.mrb[2].mxu1 }
 0x1f3   :  { %v263_v43 = vpop.f32.mrb[3].mxu1 }
 0x1f4   :  { %v1262_v44 = vpack.c.bf16 %v1060_v42, %v263_v43 }
 0x1f6   :  { %1263 = vmatprep.subr.bf16.mxu1 %v1262_v44 }
 0x1f7   :  { %1265 = vmatpush3.bf16.msra.mxu1 %v1262_v44 }
 0x1f8   :  { %1299 = vmatprep.subr.bf16.mxu1 %v1298_v37 }
 0x1fa   :  { %1066 = vmatmul.mubr.msk.f32.vlgmr.msra.gmra.mrb[4].mxu1 %vm115_vm0, %v1557_v32 }
 0x1fb   :  { %1301 = vmatpush3.bf16.msra.mxu1 %v1298_v37  ;;  %1107 = vmatprep.mubr.msk.f32.mxu1 %vm115_vm0, %v1531_v26 }
 0x1fc   :  { %1303 = vmatprep.subr.bf16.mxu1 %v1428_v3 }
 0x1fe   :  { %1108 = vmatmul.mubr.msk.f32.vlgmr.msra.gmra.mrb[6].mxu1 %vm115_vm0, %v1557_v32 }
 0x1ff   :  { %1305 = vmatpush3.bf16.msra.mxu1 %v1428_v3  ;;  %1142 = vmatprep.mubr.f32.mxu1 %v499_v45 }
 0x200   :  { %1307 = vmatprep.subr.bf16.mxu1 %v1433_v5 }
 0x203   :  { %1309 = vmatpush3.bf16.msra.mxu1 %v1433_v5 }
 0x204   :  { %1311 = vmatprep.subr.bf16.mxu1 %v1444_v8 }
 0x207   :  { %1313 = vmatpush3.bf16.msra.mxu1 %v1444_v8 }
 0x208   :  { %1315 = vmatprep.subr.bf16.mxu1 %v1460_v12 }
 0x20b   :  { %1317 = vmatpush3.bf16.msra.mxu1 %v1460_v12 }
 0x20c   :  { %1319 = vmatprep.subr.bf16.mxu1 %v1470_v15 }
 0x20f   :  { %1321 = vmatpush3.bf16.msra.mxu1 %v1470_v15 }
 0x210   :  { %1323 = vmatprep.subr.bf16.mxu1 %v1480_v18 }
 0x213   :  { %1325 = vmatpush3.bf16.msra.mxu1 %v1480_v18 }
 0x214   :  { %1327 = vmatprep.subr.bf16.mxu1 %v1490_v21 }
 0x217   :  { %1329 = vmatpush3.bf16.msra.mxu1 %v1490_v21 }
 0x218   :  { %1331 = vmatprep.subr.bf16.mxu1 %v1500_v24 }
 0x21b   :  { %1333 = vmatpush3.bf16.msra.mxu1 %v1500_v24 }
 0x21e   :  { %1143 = vmatmul.mubr.f32.vlgmr.msra.gmra.mrb[8].mxu1 %v500_v46 }
 0x21f   :  { %1149 = vmatprep.mubr.msk.f32.mxu1 %vm115_vm0, %v1531_v26 }
 0x2cd   :  { %v1067_v50 = vpop.f32.mrb[4].mxu1 }
 0x2ce   :  { %v806_v52 = vmul.f32 %v1067_v50, %v1067_v50  ;;  %v808_v53 = vmul.f32 %v1067_v50, %v1025_v40  ;;  %v338_v54 = vpop.f32.mrb[5].mxu1 }
 0x2cf   :  { %v805_v56 = vmul.f32 %v338_v54, %v338_v54  ;;  %v807_v57 = vmul.f32 %v338_v54, %v188_v41 }
 0x2d0   :  { %v826_v58 = vadd.f32 %v806_v52, %v804_v51  ;;  %v816_v10 = vmul.f32 2.0, %v808_v53 }
 0x2d1   :  { %v825_v59 = vadd.f32 %v805_v56, %v803_v55  ;;  %v1109_v60 = vpop.f32.mrb[6].mxu1  ;;  %v815_v15 = vmul.f32 2.0, %v807_v57 }
 0x2d2   :  { %v810_v61 = vsub.f32 %v1109_v60, %v804_v51  ;;  %v490_v62 = vpop.f32.mrb[7].mxu1  ;;  %v828_v11 = vadd.f32 0.0001, %v826_v58  ;;  %v818_v23 = vadd.f32 0.0001, %v816_v10 }
 0x2d3   :  { %v809_v63 = vsub.f32 %v490_v62, %v803_v55  ;;  %v827_v16 = vadd.f32 0.0001, %v825_v59  ;;  %v817_v25 = vadd.f32 0.0001, %v815_v15 }
 0x2f1   :  { %v1144_v0 = vpop.f32.mrb[8].mxu1 }
 0x2f2   :  { %v567_v1 = vpop.f32.mrb[9].mxu1 }
 0x2f3   :  { %v1334_v2 = vpack.c.bf16 %v1144_v0, %v567_v1 }
 0x2f5   :  { %1335 = vmatprep.subr.bf16.mxu1 %v1334_v2 }
 0x2f6   :  { %1337 = vmatpush3.bf16.msra.mxu1 %v1334_v2 }
 0x2f7   :  { %1371 = vmatprep.subr.bf16.mxu1 %v1370_v49 }
 0x2f9   :  { %1150 = vmatmul.mubr.msk.f32.vlgmr.msra.gmra.mrb[10].mxu1 %vm115_vm0, %v1557_v32 }
 0x2fa   :  { %1373 = vmatpush3.bf16.msra.mxu1 %v1370_v49  ;;  %1191 = vmatprep.mubr.msk.f32.mxu1 %vm115_vm0, %v1531_v26 }
 0x2fd   :  { %1192 = vmatmul.mubr.msk.f32.vlgmr.msra.gmra.mrb[12].mxu1 %vm115_vm0, %v1557_v32 }
 0x3cc   :  { %v1151_v3 = vpop.f32.mrb[10].mxu1 }
 0x3cd   :  { %v812_v4 = vsub.f32 %v1151_v3, %v806_v52  ;;  %v642_v5 = vpop.f32.mrb[11].mxu1 }
 0x3ce   :  { %v811_v6 = vsub.f32 %v642_v5, %v805_v56 }
 0x3cf   :  { %v830_v7 = vadd.f32 %v812_v4, %v810_v61 }
 0x3d0   :  { %v829_v8 = vadd.f32 %v811_v6, %v809_v63  ;;  %v1193_v9 = vpop.f32.mrb[12].mxu1 }
 0x3d1   :  { %v832_v12 = vadd.f32 0.0009, %v830_v7  ;;  %v814_v13 = vsub.f32 %v1193_v9, %v808_v53  ;;  %v794_v14 = vpop.f32.mrb[13].mxu1 }
 0x3d2   :  { %v831_v17 = vadd.f32 0.0009, %v829_v8  ;;  %v813_v18 = vsub.f32 %v794_v14, %v807_v57 }
 0x3d3   :  { %v834_v19 = vmul.f32 %v832_v12, %v828_v11  ;;  %v820_v20 = vmul.f32 2.0, %v814_v13 }
 0x3d4   :  { %v833_v21 = vmul.f32 %v831_v17, %v827_v16  ;;  %v819_v22 = vmul.f32 2.0, %v813_v18 }
 0x3d5   :  { %1377 = vrcp.f32 %v834_v19  ;;  %v822_v24 = vadd.f32 0.0009, %v820_v20 }
 0x3d6   :  { %1379 = vrcp.f32 %v833_v21  ;;  %v821_v26 = vadd.f32 0.0009, %v819_v22 }
 0x3d7   :  { %v824_v27 = vmul.f32 %v822_v24, %v818_v23 }
 0x3d8   :  { %v823_v28 = vmul.f32 %v821_v26, %v817_v25 }
 0x3df   :  { %v1378_v29 = vpop.eup %1377 }
 0x3e0   :  { %v1380_v30 = vpop.eup %1379  ;;  %v838_v31 = vmul.f32 %v1378_v29, %v824_v27 }
 0x3e1   :  { %v836_v32 = vmul.f32 %v1380_v30, %v823_v28 }
 0x3e3   :  { %v839_v33 = vadd.f32 %v838_v31, %v836_v32 }
 0x3e5   :  { %840 = vadd.xlane.f32.xlu0 %v839_v33 }
 0x472   :  { %v841_v34 = vpop.xlane.xlu0 %840 }
 0x473   :  { %v842_v35 = vrot.slane %v841_v34, 4 }
 0x475   :  { %v843_v36 = vadd.f32 %v842_v35, %v841_v34 }
 0x477   :  { %v844_v37 = vrot.slane %v843_v36, 2 }
 0x479   :  { %v845_v38 = vadd.f32 %v844_v37, %v843_v36 }
 0x47b   :  { %v846_v39 = vrot.slane %v845_v38, 1 }
 0x47d   :  { %v847_v40 = vadd.f32 %v846_v39, %v845_v38 }
 0x47f   :  { %1374 = vpush %v847_v40 }
 0x4b0   :  { %s1375_s1 = spop %1374 }
 0x4b1   :  { %850 = sst [smem:[#allocation2]] %s1375_s1 }
 0x4b2   :  { %1390 = shalt.err (!%p1387_p2)
}
 0x4b3   :  { %s1393_s11 = smov [#allocation2]  }
 0x4b4   :  { %858 = dma.smem_to_hbm %s1393_s11, 16, %s1633_s4, [#allocation3]  }
 0x4b5   :  { %1391 = dma.done.wait [#allocation3], 16  }
 0x4b6   :  { %1392 = vsyncadd [#allocation3], 4294967280 }
 0x4b7   :  { %862 = sfence }
 0x4b8   :  { %863 = vsyncpa [#allocation3], 1 }

</bundles_post_ra>
